<compile_context>
chip_gen: v5e
topology: v5e:2x2
jax: 0.10.0
libtpu: 0.0.40
codegen_flags: <defaults>
</compile_context>

<pallas_src>
import functools

import jax
import jax.numpy as jnp
from jax.experimental import pallas as pl
from jax.experimental.pallas import tpu as pltpu


def _attention_head_kernel(x_ref, w1_ref, b1_ref, w2r_ref, b2_ref, o_ref,
                           *, matmul_dtype):
    tb, s, d = x_ref.shape
    h_dim = w1_ref.shape[1]

    x = x_ref[...]                                      # (TB, S, D), caller dtype
    x_mm = x if x.dtype == matmul_dtype else x.astype(matmul_dtype)
    x2d = x_mm.reshape(tb * s, d)                       # flat rows for the MXU

    # ---- linear1 + tanh: single MXU matmul with M = TB*S rows, f32 accumulation.
    # W1 arrives already in matmul_dtype (cast once in the wrapper).
    h = jnp.tanh(
        jnp.dot(x2d, w1_ref[...], preferred_element_type=jnp.float32)
        + b1_ref[...]                                   # (1, H) f32 broadcast
    )                                                   # (TB*S, H) f32

    # ---- linear2 (H -> 1): VPU multiply + lane reduce (avoid an N=1 MXU matmul).
    # TODO(synk): if bundle dumps show the XLU/VALU slot saturating on v6e/v7x,
    # move this onto the MXU as (TB*S, H) @ (H, 128 zero-padded) and slice col 0.
    h3 = h.reshape(tb, s, h_dim)                        # (TB, S, H)
    w2_row = w2r_ref[...].reshape(1, 1, h_dim)          # (1, 1, H) f32
    score = jnp.sum(h3 * w2_row, axis=-1) + b2_ref[...]   # (TB, S), S lane-major

    # ---- softmax over the sequence axis (last-axis lane reduces, exact divide).
    score = score - jnp.max(score, axis=-1, keepdims=True)
    e = jnp.exp(score)
    weights = e / jnp.sum(e, axis=-1, keepdims=True)    # (TB, S) f32

    # ---- weighted pooling on the MXU: out[b, d] = sum_s w[b, s] * x[b, s, d].
    # bf16 operands (per review), f32 accumulation.
    pooled = jnp.einsum(
        "bqs,bsd->bqd",
        weights[:, None, :].astype(matmul_dtype),
        x_mm,
        preferred_element_type=jnp.float32,
    )                                                   # (TB, 1, D)
    o_ref[...] = pooled.reshape(tb, d).astype(o_ref.dtype)


def _vmem_capacity_bytes():
    try:
        return int(pltpu.get_tpu_info().vmem_capacity_bytes)
    except Exception:
        return 64 << 20  # conservative default: v7x-sized per-core VMEM


def _choose_tb(B, S, D, H, x_bytes, mm_bytes, vmem_cap):
    """Generation-aware batch tile: biggest TB that fits ~60% of VMEM."""
    if B <= 8:
        return B                        # single step; output block equals full dims
    per_row = (2 * S * D * x_bytes      # double-buffered x tile
               + S * D * mm_bytes       # MXU-dtype copy of x
               + S * H * 4              # tanh activation (f32)
               + (4 * S + 2 * D) * 4)   # scores / softmax / pooled temporaries
    budget = int(vmem_cap * 0.6)
    tb = (budget // per_row) // 8 * 8
    tb = max(8, min(32, tb))
    # Keep >= 2 grid steps so dimension_semantics=("parallel",) can shard the
    # batch across TensorCores (matters on 2-TC / 64 MiB parts).
    half_rounded = ((((B + 1) // 2) + 7) // 8) * 8
    tb = min(tb, max(8, half_rounded))
    return tb


def attention_head(x, w1, b1, w2, b2, *, tb=None, matmul_dtype=jnp.bfloat16,
                   out_dtype=None):
    """x: [B, S, D]; w1: [D, H]; b1: [H]; w2: [H, 1]; b2: [1] -> [B, D]."""
    B, S, D = x.shape
    H = w1.shape[1]
    if out_dtype is None:
        out_dtype = x.dtype

    # Constant operands: cast / reshape once in the wrapper (never per grid step).
    w1_mm = w1.astype(matmul_dtype)                     # (D, H) MXU dtype
    b1_2d = b1.reshape(1, H).astype(jnp.float32)
    w2_row = w2.reshape(1, H).astype(jnp.float32)       # (H,1) -> row for lane reduce
    b2_2d = b2.reshape(1, 1).astype(jnp.float32)

    x_bytes = jnp.dtype(x.dtype).itemsize
    mm_bytes = jnp.dtype(matmul_dtype).itemsize
    vmem_cap = _vmem_capacity_bytes()
    if tb is None:
        tb = _choose_tb(B, S, D, H, x_bytes, mm_bytes, vmem_cap)
    grid = (pl.cdiv(B, tb),)

    # Scoped-VMEM limit sized to the real footprint (2x headroom), capped at
    # the physical capacity.
    footprint = (2 * tb * S * D * x_bytes               # double-buffered x tile
                 + tb * S * D * mm_bytes                # MXU-dtype copy of x
                 + tb * S * H * 4                       # tanh activation (f32)
                 + 2 * D * H * mm_bytes                 # W1 (up to 2 buffers)
                 + 2 * tb * D * 4                       # output block buffers
                 + tb * (4 * S + 2 * D) * 4)            # softmax / pooled temporaries
    vmem_limit = int(min(max(2 * footprint, 32 << 20), vmem_cap, 128 << 20))

    kernel = functools.partial(_attention_head_kernel, matmul_dtype=matmul_dtype)

    def make_in_specs(single_buffer_consts):
        const_kw = {"pipeline_mode": pl.Buffered(1)} if single_buffer_consts else {}
        return [
            pl.BlockSpec((tb, S, D), lambda b: (b, 0, 0)),            # x batch tile
            pl.BlockSpec((D, H), lambda b: (0, 0), **const_kw),       # W1 (constant)
            pl.BlockSpec((1, H), lambda b: (0, 0), **const_kw),       # b1 (constant)
            pl.BlockSpec((1, H), lambda b: (0, 0), **const_kw),       # W2 row (constant)
            pl.BlockSpec((1, 1), lambda b: (0, 0), **const_kw),       # b2 (constant)
        ]

    def run(single_buffer_consts):
        return pl.pallas_call(
            kernel,
            out_shape=jax.ShapeDtypeStruct((B, D), out_dtype),
            grid_spec=pltpu.PrefetchScalarGridSpec(
                num_scalar_prefetch=0,
                grid=grid,
                in_specs=make_in_specs(single_buffer_consts),
                out_specs=pl.BlockSpec((tb, D), lambda b: (b, 0)),    # lane-dense (TB, D)
            ),
            compiler_params=pltpu.CompilerParams(
                dimension_semantics=("parallel",),                    # megacore over batch
                vmem_limit_bytes=vmem_limit,
            ),
        )(x, w1_mm, b1_2d, w2_row, b2_2d)

    try:
        return run(True)
    except Exception:
        # pl.Buffered(1) / pipeline_mode not supported on this jax version:
        # fall back to default (double-buffered) constant operands.
        return run(False)


def attention_head_ref(x, w1, b1, w2, b2):
    h = jnp.tanh(jnp.einsum("bsd,dh->bsh", x, w1) + b1)
    s = jnp.einsum("bsh,ho->bso", h, w2) + b2
    w = jax.nn.softmax(s, axis=1)
    return jnp.sum(w * x, axis=1)


if __name__ == "__main__":
    # Small shapes consistent with the module: batch=2, seq=8, input_dim=32, hidden_dim=16.
    B, S, D, H = 2, 8, 32, 16

    key = jax.random.PRNGKey(0)
    kx, kw1, kb1, kw2, kb2 = jax.random.split(key, 5)

    x = jax.random.normal(kx, (B, S, D), dtype=jnp.float32)
    # Deterministic synthetic parameters (nn.Linear shapes, pre-transposed).
    w1 = jax.random.normal(kw1, (D, H), dtype=jnp.float32) * 0.1
    b1 = jax.random.normal(kb1, (H,), dtype=jnp.float32) * 0.1
    w2 = jax.random.normal(kw2, (H, 1), dtype=jnp.float32) * 0.1
    b2 = jax.random.normal(kb2, (1,), dtype=jnp.float32) * 0.1

    ref = attention_head_ref(x, w1, b1, w2, b2)

    # 1) Default path: bf16 MXU operands, f32 accumulation / softmax / output.
    out = jax.block_until_ready(attention_head(x, w1, b1, w2, b2))
    assert out.shape == (B, D)
    assert jnp.allclose(out, ref, atol=5e-2, rtol=5e-2), "mismatch (bf16 MXU path)"

    # 2) Full-f32 path for a tight correctness check.
    out_f32 = jax.block_until_ready(
        attention_head(x, w1, b1, w2, b2, matmul_dtype=jnp.float32))
    assert jnp.allclose(out_f32, ref, atol=2e-3, rtol=2e-3), "mismatch (f32 path)"

    # 3) Multi-step grid with a ragged last batch block (no wrapper pad) and
    #    bf16 activations straight from HBM (halved x traffic).
    B2 = 13
    x2_bf16 = jax.random.normal(jax.random.PRNGKey(1), (B2, S, D),
                                dtype=jnp.float32).astype(jnp.bfloat16)
    out2 = jax.block_until_ready(
        attention_head(x2_bf16, w1, b1, w2, b2, out_dtype=jnp.float32))
    ref2 = attention_head_ref(x2_bf16.astype(jnp.float32), w1, b1, w2, b2)
    assert out2.shape == (B2, D)
    assert jnp.allclose(out2, ref2, atol=5e-2, rtol=5e-2), "mismatch (ragged grid)"

    print("KERNEL_OK")
</pallas_src>

<mosaic_0001>
module attributes {stable_mosaic.version = 11 : i64} {
  func.func @_attention_head_kernel(%arg0: i32, %arg1: memref<2x8x32xf32, #tpu.memory_space<vmem>>, %arg2: memref<32x16xbf16, #tpu.memory_space<vmem>>, %arg3: memref<1x16xf32, #tpu.memory_space<vmem>>, %arg4: memref<1x16xf32, #tpu.memory_space<vmem>>, %arg5: memref<1x1xf32, #tpu.memory_space<vmem>>, %arg6: memref<2x32xf32, #tpu.memory_space<vmem>>) attributes {dimension_semantics = [#tpu.dimension_semantics<parallel>], iteration_bounds = array<i64: 1>, scalar_prefetch = 0 : i64, scratch_operands = 0 : i64, tpu.core_type = #tpu.core_type<tc>, window_params = [{transform_indices = @transform_0, window_bounds = array<i64: 2, 8, 32>}, {pipeline_mode = #tpu.pipeline_mode<synchronous>, transform_indices = @transform_1, window_bounds = array<i64: 32, 16>}, {pipeline_mode = #tpu.pipeline_mode<synchronous>, transform_indices = @transform_2, window_bounds = array<i64: 1, 16>}, {pipeline_mode = #tpu.pipeline_mode<synchronous>, transform_indices = @transform_3, window_bounds = array<i64: 1, 16>}, {pipeline_mode = #tpu.pipeline_mode<synchronous>, transform_indices = @transform_4, window_bounds = array<i64: 1, 1>}, {transform_indices = @transform_5, window_bounds = array<i64: 2, 32>}]} {
    %c0 = arith.constant 0 : index
    %c0_0 = arith.constant 0 : index
    %c0_1 = arith.constant 0 : index
    %0 = vector.load %arg1[%c0, %c0_0, %c0_1] : memref<2x8x32xf32, #tpu.memory_space<vmem>>, vector<2x8x32xf32>
    %1 = arith.truncf %0 : vector<2x8x32xf32> to vector<2x8x32xbf16>
    %2 = vector.shape_cast %1 : vector<2x8x32xbf16> to vector<16x32xbf16>
    %c0_2 = arith.constant 0 : index
    %c0_3 = arith.constant 0 : index
    %3 = vector.load %arg2[%c0_2, %c0_3] : memref<32x16xbf16, #tpu.memory_space<vmem>>, vector<32x16xbf16>
    %cst = arith.constant dense<0.000000e+00> : vector<16x16xf32>
    %4 = tpu.matmul %2, %3, %cst {dimension_numbers = #tpu.dot_dimension_numbers<[1], [0], [0], [1], [0, 0, 1, 1], [], []>} : vector<16x32xbf16>, vector<32x16xbf16>, vector<16x16xf32> -> vector<16x16xf32>
    %c0_4 = arith.constant 0 : index
    %c0_5 = arith.constant 0 : index
    %5 = vector.load %arg3[%c0_4, %c0_5] : memref<1x16xf32, #tpu.memory_space<vmem>>, vector<1x16xf32>
    %6 = vector.broadcast %5 : vector<1x16xf32> to vector<16x16xf32>
    %7 = arith.addf %4, %6 : vector<16x16xf32>
    %8 = math.tanh %7 : vector<16x16xf32>
    %9 = vector.shape_cast %8 : vector<16x16xf32> to vector<2x8x16xf32>
    %c0_6 = arith.constant 0 : index
    %c0_7 = arith.constant 0 : index
    %10 = vector.load %arg4[%c0_6, %c0_7] : memref<1x16xf32, #tpu.memory_space<vmem>>, vector<1x16xf32>
    %11 = vector.shape_cast %10 : vector<1x16xf32> to vector<1x1x16xf32>
    %12 = vector.broadcast %11 : vector<1x1x16xf32> to vector<2x8x16xf32>
    %13 = arith.mulf %9, %12 : vector<2x8x16xf32>
    %cst_8 = arith.constant dense<0.000000e+00> : vector<2x8xf32>
    %14 = vector.multi_reduction <add>, %13, %cst_8 [2] : vector<2x8x16xf32> to vector<2x8xf32>
    %c0_9 = arith.constant 0 : index
    %c0_10 = arith.constant 0 : index
    %15 = vector.load %arg5[%c0_9, %c0_10] : memref<1x1xf32, #tpu.memory_space<vmem>>, vector<1x1xf32>
    %16 = vector.broadcast %15 : vector<1x1xf32> to vector<2x8xf32>
    %17 = arith.addf %14, %16 : vector<2x8xf32>
    %cst_11 = arith.constant dense<0xFF800000> : vector<2xf32>
    %18 = vector.multi_reduction <maximumf>, %17, %cst_11 [1] : vector<2x8xf32> to vector<2xf32>
    %19 = vector.shape_cast %18 : vector<2xf32> to vector<2x1xf32>
    %20 = vector.broadcast %19 : vector<2x1xf32> to vector<2x8xf32>
    %21 = arith.subf %17, %20 : vector<2x8xf32>
    %22 = math.exp %21 : vector<2x8xf32>
    %cst_12 = arith.constant dense<0.000000e+00> : vector<2xf32>
    %23 = vector.multi_reduction <add>, %22, %cst_12 [1] : vector<2x8xf32> to vector<2xf32>
    %24 = vector.shape_cast %23 : vector<2xf32> to vector<2x1xf32>
    %25 = vector.broadcast %24 : vector<2x1xf32> to vector<2x8xf32>
    %26 = arith.divf %22, %25 : vector<2x8xf32>
    %27 = vector.shape_cast %26 : vector<2x8xf32> to vector<2x1x8xf32>
    %28 = arith.truncf %27 : vector<2x1x8xf32> to vector<2x1x8xbf16>
    "tpu.trace_start"() <{level = 10 : i32, message = "bqs,bsd->bqd"}> : () -> ()
    %cst_13 = arith.constant dense<0.000000e+00> : vector<2x1x32xf32>
    %29 = tpu.matmul %28, %1, %cst_13 {dimension_numbers = #tpu.dot_dimension_numbers<[2], [1], [1], [2], [0, 0, 0, 1, 1, 2], [0], [0]>} : vector<2x1x8xbf16>, vector<2x8x32xbf16>, vector<2x1x32xf32> -> vector<2x1x32xf32>
    "tpu.trace_stop"() : () -> ()
    %30 = vector.shape_cast %29 : vector<2x1x32xf32> to vector<2x32xf32>
    %c0_14 = arith.constant 0 : index
    %c0_15 = arith.constant 0 : index
    %31 = vector.load %arg6[%c0_14, %c0_15] : memref<2x32xf32, #tpu.memory_space<vmem>>, vector<2x32xf32>
    tpu.vector_store %arg6[%c0_14, %c0_15], %30 {strides = array<i32>} : memref<2x32xf32, #tpu.memory_space<vmem>>, vector<2x32xf32>,
    return
  }
  func.func @transform_0(%arg0: i32) -> (i32, i32, i32) {
    %c0_i32 = arith.constant 0 : i32
    %c0_i32_0 = arith.constant 0 : i32
    %c0_i32_1 = arith.constant 0 : i32
    return %arg0, %c0_i32, %c0_i32_0 : i32, i32, i32
  }
  func.func @transform_1(%arg0: i32) -> (i32, i32) {
    %c0_i32 = arith.constant 0 : i32
    %c0_i32_0 = arith.constant 0 : i32
    %c0_i32_1 = arith.constant 0 : i32
    return %c0_i32, %c0_i32_0 : i32, i32
  }
  func.func @transform_2(%arg0: i32) -> (i32, i32) {
    %c0_i32 = arith.constant 0 : i32
    %c0_i32_0 = arith.constant 0 : i32
    %c0_i32_1 = arith.constant 0 : i32
    return %c0_i32, %c0_i32_0 : i32, i32
  }
  func.func @transform_3(%arg0: i32) -> (i32, i32) {
    %c0_i32 = arith.constant 0 : i32
    %c0_i32_0 = arith.constant 0 : i32
    %c0_i32_1 = arith.constant 0 : i32
    return %c0_i32, %c0_i32_0 : i32, i32
  }
  func.func @transform_4(%arg0: i32) -> (i32, i32) {
    %c0_i32 = arith.constant 0 : i32
    %c0_i32_0 = arith.constant 0 : i32
    %c0_i32_1 = arith.constant 0 : i32
    return %c0_i32, %c0_i32_0 : i32, i32
  }
  func.func @transform_5(%arg0: i32) -> (i32, i32) {
    %c0_i32 = arith.constant 0 : i32
    %c0_i32_0 = arith.constant 0 : i32
    return %arg0, %c0_i32 : i32, i32
  }
}

module attributes {stable_mosaic.version = 11 : i64} {
  func.func @_attention_head_kernel(%arg0: i32, %arg1: memref<2x8x32xf32, #tpu.memory_space<vmem>>, %arg2: memref<32x16xbf16, #tpu.memory_space<vmem>>, %arg3: memref<1x16xf32, #tpu.memory_space<vmem>>, %arg4: memref<1x16xf32, #tpu.memory_space<vmem>>, %arg5: memref<1x1xf32, #tpu.memory_space<vmem>>, %arg6: memref<2x32xf32, #tpu.memory_space<vmem>>) attributes {dimension_semantics = [#tpu.dimension_semantics<parallel>], iteration_bounds = array<i64: 1>, scalar_prefetch = 0 : i64, scratch_operands = 0 : i64, tpu.core_type = #tpu.core_type<tc>, window_params = [{transform_indices = @transform_0, window_bounds = array<i64: 2, 8, 32>}, {pipeline_mode = #tpu.pipeline_mode<synchronous>, transform_indices = @transform_1, window_bounds = array<i64: 32, 16>}, {pipeline_mode = #tpu.pipeline_mode<synchronous>, transform_indices = @transform_2, window_bounds = array<i64: 1, 16>}, {pipeline_mode = #tpu.pipeline_mode<synchronous>, transform_indices = @transform_3, window_bounds = array<i64: 1, 16>}, {pipeline_mode = #tpu.pipeline_mode<synchronous>, transform_indices = @transform_4, window_bounds = array<i64: 1, 1>}, {transform_indices = @transform_5, window_bounds = array<i64: 2, 32>}]} {
    %c0 = arith.constant 0 : index
    %c0_0 = arith.constant 0 : index
    %c0_1 = arith.constant 0 : index
    %0 = vector.load %arg1[%c0, %c0_0, %c0_1] : memref<2x8x32xf32, #tpu.memory_space<vmem>>, vector<2x8x32xf32>
    %1 = arith.truncf %0 : vector<2x8x32xf32> to vector<2x8x32xbf16>
    %2 = vector.shape_cast %1 : vector<2x8x32xbf16> to vector<16x32xbf16>
    %c0_2 = arith.constant 0 : index
    %c0_3 = arith.constant 0 : index
    %3 = vector.load %arg2[%c0_2, %c0_3] : memref<32x16xbf16, #tpu.memory_space<vmem>>, vector<32x16xbf16>
    %cst = arith.constant dense<0.000000e+00> : vector<16x16xf32>
    %4 = tpu.matmul %2, %3, %cst {dimension_numbers = #tpu.dot_dimension_numbers<[1], [0], [0], [1], [0, 0, 1, 1], [], []>} : vector<16x32xbf16>, vector<32x16xbf16>, vector<16x16xf32> -> vector<16x16xf32>
    %c0_4 = arith.constant 0 : index
    %c0_5 = arith.constant 0 : index
    %5 = vector.load %arg3[%c0_4, %c0_5] : memref<1x16xf32, #tpu.memory_space<vmem>>, vector<1x16xf32>
    %6 = vector.broadcast %5 : vector<1x16xf32> to vector<16x16xf32>
    %7 = arith.addf %4, %6 : vector<16x16xf32>
    %8 = math.tanh %7 : vector<16x16xf32>
    %9 = vector.shape_cast %8 : vector<16x16xf32> to vector<2x8x16xf32>
    %c0_6 = arith.constant 0 : index
    %c0_7 = arith.constant 0 : index
    %10 = vector.load %arg4[%c0_6, %c0_7] : memref<1x16xf32, #tpu.memory_space<vmem>>, vector<1x16xf32>
    %11 = vector.shape_cast %10 : vector<1x16xf32> to vector<1x1x16xf32>
    %12 = vector.broadcast %11 : vector<1x1x16xf32> to vector<2x8x16xf32>
    %13 = arith.mulf %9, %12 : vector<2x8x16xf32>
    %cst_8 = arith.constant dense<0.000000e+00> : vector<2x8xf32>
    %14 = vector.multi_reduction <add>, %13, %cst_8 [2] : vector<2x8x16xf32> to vector<2x8xf32>
    %c0_9 = arith.constant 0 : index
    %c0_10 = arith.constant 0 : index
    %15 = vector.load %arg5[%c0_9, %c0_10] : memref<1x1xf32, #tpu.memory_space<vmem>>, vector<1x1xf32>
    %16 = vector.broadcast %15 : vector<1x1xf32> to vector<2x8xf32>
    %17 = arith.addf %14, %16 : vector<2x8xf32>
    %cst_11 = arith.constant dense<0xFF800000> : vector<2xf32>
    %18 = vector.multi_reduction <maximumf>, %17, %cst_11 [1] : vector<2x8xf32> to vector<2xf32>
    %19 = vector.shape_cast %18 : vector<2xf32> to vector<2x1xf32>
    %20 = vector.broadcast %19 : vector<2x1xf32> to vector<2x8xf32>
    %21 = arith.subf %17, %20 : vector<2x8xf32>
    %22 = math.exp %21 : vector<2x8xf32>
    %cst_12 = arith.constant dense<0.000000e+00> : vector<2xf32>
    %23 = vector.multi_reduction <add>, %22, %cst_12 [1] : vector<2x8xf32> to vector<2xf32>
    %24 = vector.shape_cast %23 : vector<2xf32> to vector<2x1xf32>
    %25 = vector.broadcast %24 : vector<2x1xf32> to vector<2x8xf32>
    %26 = arith.divf %22, %25 : vector<2x8xf32>
    %27 = vector.shape_cast %26 : vector<2x8xf32> to vector<2x1x8xf32>
    %28 = arith.truncf %27 : vector<2x1x8xf32> to vector<2x1x8xbf16>
    "tpu.trace_start"() <{level = 10 : i32, message = "bqs,bsd->bqd"}> : () -> ()
    %cst_13 = arith.constant dense<0.000000e+00> : vector<2x1x32xf32>
    %29 = tpu.matmul %28, %1, %cst_13 {dimension_numbers = #tpu.dot_dimension_numbers<[2], [1], [1], [2], [0, 0, 0, 1, 1, 2], [0], [0]>} : vector<2x1x8xbf16>, vector<2x8x32xbf16>, vector<2x1x32xf32> -> vector<2x1x32xf32>
    "tpu.trace_stop"() : () -> ()
    %30 = vector.shape_cast %29 : vector<2x1x32xf32> to vector<2x32xf32>
    %c0_14 = arith.constant 0 : index
    %c0_15 = arith.constant 0 : index
    %31 = vector.load %arg6[%c0_14, %c0_15] : memref<2x32xf32, #tpu.memory_space<vmem>>, vector<2x32xf32>
    tpu.vector_store %arg6[%c0_14, %c0_15], %30 {strides = array<i32>} : memref<2x32xf32, #tpu.memory_space<vmem>>, vector<2x32xf32>,
    return
  }
  func.func @transform_0(%arg0: i32) -> (i32, i32, i32) {
    %c0_i32 = arith.constant 0 : i32
    %c0_i32_0 = arith.constant 0 : i32
    %c0_i32_1 = arith.constant 0 : i32
    return %arg0, %c0_i32, %c0_i32_0 : i32, i32, i32
  }
  func.func @transform_1(%arg0: i32) -> (i32, i32) {
    %c0_i32 = arith.constant 0 : i32
    %c0_i32_0 = arith.constant 0 : i32
    %c0_i32_1 = arith.constant 0 : i32
    return %c0_i32, %c0_i32_0 : i32, i32
  }
  func.func @transform_2(%arg0: i32) -> (i32, i32) {
    %c0_i32 = arith.constant 0 : i32
    %c0_i32_0 = arith.constant 0 : i32
    %c0_i32_1 = arith.constant 0 : i32
    return %c0_i32, %c0_i32_0 : i32, i32
  }
  func.func @transform_3(%arg0: i32) -> (i32, i32) {
    %c0_i32 = arith.constant 0 : i32
    %c0_i32_0 = arith.constant 0 : i32
    %c0_i32_1 = arith.constant 0 : i32
    return %c0_i32, %c0_i32_0 : i32, i32
  }
  func.func @transform_4(%arg0: i32) -> (i32, i32) {
    %c0_i32 = arith.constant 0 : i32
    %c0_i32_0 = arith.constant 0 : i32
    %c0_i32_1 = arith.constant 0 : i32
    return %c0_i32, %c0_i32_0 : i32, i32
  }
  func.func @transform_5(%arg0: i32) -> (i32, i32) {
    %c0_i32 = arith.constant 0 : i32
    %c0_i32_0 = arith.constant 0 : i32
    return %arg0, %c0_i32 : i32, i32
  }
}

</mosaic_0001>

<bundles_post_ra>
// kernel: tpu_custom_call.1
= control target key start
LH: loop header
LB: loop body
LE: loop exit
PB: predicated region body
PF: predicated region fallthrough
CT: control target
= control target key end

     0   :  { %s390_s0 = inlined_call_operand.vmem [shape: f32[2,8,32], index: 0, kind: input, shape index: {}]   ;;  %s391_s1 = inlined_call_operand.vmem [shape: bf16[32,16], index: 1, kind: input, shape index: {}]   ;;  %s392_s2 = inlined_call_operand.vmem [shape: f32[1,16], index: 2, kind: input, shape index: {}]   ;;  %s393_s3 = inlined_call_operand.vmem [shape: f32[1,16], index: 3, kind: input, shape index: {}]   ;;  %s394_s4 = inlined_call_operand.<no memory space> [shape: f32[1,1], index: 4, kind: input, shape index: {}]   ;;  %s395_s5 = inlined_call_operand.hbm [shape: f32[2,32], index: 5, kind: output, shape index: {}]  }
   0x1   :  { %v10_v0 = vstv %s394_s4 }
   0x2   :  { %11 = vst [vmem:[#allocation2] sm:$0x1] %v10_v0 }
   0x3   :  { %v266_v1 = vld [vmem:[%s391_s1 + $0x8] sm:$0xff]  ;;  %v24_v2 = vld [vmem:[%s390_s0] sm:$0xff] }
   0x4   :  { %v265_v3 = vld [vmem:[%s391_s1] sm:$0xff]  ;;  %v25_v4 = vld [vmem:[%s390_s0 + $0x8] sm:$0xff]  ;;  %v360_v5 = vpack.c.bf16 %v24_v2, %v24_v2  ;;  %63 = vmatpush.bf16.msra.mxu0 %v266_v1 }
   0x5   :  { %v362_v6 = vpack.c.bf16 %v25_v4, %v25_v4 }
   0x6   :  { %12 = vsyncpa [#allocation4], 0  ;;  %v38_v7 = vunpack.c.l.b16 %v360_v5  ;;  %vm53_vm0 = vcmask 261120   ;;  %v313_v10 = vmov 0   ;;  %v272_v12 = vld [vmem:[%s392_s2] ss:$0 sm:$0xff]  ;;  %v97_v25 = vlaneseq }
   0x7   :  { %v39_v8 = vunpack.c.l.b16 %v362_v6  ;;  %269 = vset.pattern.permute.xlu1 %v313_v10  ;;  %270 = vset.pattern.permute.xlu2 %v313_v10  ;;  %v273_v15 = vld [vmem:[%s393_s3] ss:$0 sm:$0xff]  ;;  %vm79_vm1 = vcmask 130048   ;;  %vm101_vm2 = vcmask 1041409   ;;  %vm104_vm3 = vcmask 58368   ;;  %s314_s2 = smov [#allocation3]  }
   0x8   :  { %64 = vmatpush.bf16.msra.mxu0 %v265_v3  ;;  %271 = vset.pattern.permute.xlu0 %v313_v10  ;;  %v372_v27 = vand.u32 127, %v97_v25  ;;  %vm184_vm12 = vcmask 1043456   ;;  %vm180_vm13 = vcmask 64512   ;;  %s241_s3 = sshll.u32 %s314_s2, 4  ;;  %s243_s6 = sshll.u32 %s395_s5, 4  ;;  %vm234_vm14 = vcmask 254976   ;;  %s242_s3 = int_to_ptr.vmem [resolvable:$true] %s241_s3  ;;  %s244_s6 = int_to_ptr.hbm [resolvable:$true] %s243_s6 }
   0x9   :  { %v40_v9 = vpack.c.b16 %v39_v8, %v38_v7  ;;  %v274_v11 = vld [vmem:[#allocation2] ss:$0 sm:$0xff] }
   0xa   :  { %90 = vperm.xlu1 %269, %v274_v11  }
   0xb   :  { %260 = vmatmul.msk.bf16.vlgmr.msra.gmra.mxu0 %vm53_vm0, %v40_v9 }
  0x7c   :  { %v91_v26 = vpop.permute.xlu1 %90 }
  0x88   :  { %v66_v13 = vpop.f32.mrf.mxu0 }
  0x89   :  { %v67_v14 = vadd.f32 %v272_v12, %v66_v13 }
  0x8b   :  { %275 = vtanh.f32 %v67_v14 }
  0x90   :  { %v68_v16 = vpop.f32.mrf.mxu0 }
  0x91   :  { %v276_v17 = vpop.eup %275  ;;  %v69_v18 = vadd.f32 %v272_v12, %v68_v16 }
  0x92   :  { %v77_v19 = vmul.f32 %v276_v17, %v273_v15 }
  0x93   :  { %277 = vtanh.f32 %v69_v18 }
  0x94   :  { %v80_v20 = vsel %vm79_vm1, %v77_v19, 0.0  ;;  %v214_v19 = vsel %vm184_vm12, %v362_v6, 0 }
  0x95   :  { %81 = vadd.xlane.f32.xlu0 %v80_v20  ;;  %223 = vmatpush.bf16.msra.mxu2 %v214_v19  ;;  %v186_v20 = vsel %vm184_vm12, %v360_v5, 0 }
  0x96   :  { %195 = vmatpush.bf16.msra.mxu1 %v186_v20 }
  0x99   :  { %v278_v21 = vpop.eup %277 }
  0x9a   :  { %v78_v22 = vmul.f32 %v278_v21, %v273_v15 }
  0x9c   :  { %v83_v23 = vsel %vm79_vm1, %v78_v22, 0.0 }
  0x9d   :  { %84 = vadd.xlane.f32.xlu0 %v83_v23 }
 0x108   :  { %v82_v24 = vpop.xlane.xlu0 %81 }
 0x109   :  { %v93_v28 = vadd.f32 %v91_v26, %v82_v24 }
 0x10b   :  { %v99_v31 = vperm.slane %v93_v28, %v372_v27 }
 0x110   :  { %v85_v29 = vpop.xlane.xlu0 %84 }
 0x111   :  { %v94_v30 = vadd.f32 %v91_v26, %v85_v29 }
 0x113   :  { %v100_v32 = vperm.slane %v94_v30, %v372_v27 }
 0x115   :  { %v102_v33 = vsel %vm101_vm2, %v100_v32, %v99_v31 }
 0x116   :  { %v105_v34 = vsel %vm104_vm3, %v102_v33, -inf }
 0x117   :  { %106 = vmax.xlane.f32.xlu1 %v105_v34 }
 0x18a   :  { %v107_v35 = vpop.xlane.xlu1 %106 }
 0x18b   :  { %v109_v36 = vperm.slane %v107_v35, 0  ;;  %v110_v37 = vperm.slane %v107_v35, 1 }
 0x18d   :  { %v113_v38 = vsub.f32 %v93_v28, %v109_v36  ;;  %v114_v40 = vsub.f32 %v94_v30, %v110_v37 }
 0x18f   :  { %v115_v39 = vmul.f32 1.442695, %v113_v38  ;;  %v117_v41 = vmul.f32 1.442695, %v114_v40 }
 0x191   :  { %279 = vpow2.f32 %v115_v39 }
 0x192   :  { %281 = vpow2.f32 %v117_v41 }
 0x197   :  { %v280_v42 = vpop.eup %279 }
 0x198   :  { %122 = vperm.xlu2 %270, %v280_v42   ;;  %v282_v43 = vpop.eup %281 }
 0x1a0   :  { %125 = vperm.xlu2 %270, %v282_v43  }
 0x1f2   :  { %v123_v44 = vpop.permute.xlu2 %122 }
 0x1f3   :  { %v127_v46 = vperm.slane %v123_v44, %v372_v27 }
 0x1fa   :  { %v126_v45 = vpop.permute.xlu2 %125 }
 0x1fb   :  { %v128_v47 = vperm.slane %v126_v45, %v372_v27 }
 0x1fd   :  { %v129_v48 = vsel %vm101_vm2, %v128_v47, %v127_v46 }
 0x1fe   :  { %v131_v49 = vsel %vm104_vm3, %v129_v48, 0.0 }
 0x1ff   :  { %132 = vadd.xlane.f32.xlu0 %v131_v49 }
 0x272   :  { %v133_v50 = vpop.xlane.xlu0 %132 }
 0x273   :  { %v135_v51 = vperm.slane %v133_v50, 0  ;;  %v136_v52 = vperm.slane %v133_v50, 1 }
 0x275   :  { %283 = vrcp.f32 %v135_v51  ;;  %v150_v59 = vand.u32 2147483648, %v135_v51  ;;  %v165_v60 = vand.u32 2147483648, %v136_v52  ;;  %v148_v62 = vand.u32 2147483647, %v135_v51 }
 0x276   :  { %285 = vrcp.f32 %v136_v52  ;;  %v163_v0 = vand.u32 2147483647, %v136_v52  ;;  %vm144_vm6 = vweird.f32 %v135_v51  ;;  %vm159_vm7 = vweird.f32 %v136_v52 }
 0x277   :  { %v151_v3 = vor.u32 1.1754944e-38, %v150_v59  ;;  %v166_v4 = vor.u32 1.1754944e-38, %v165_v60  ;;  %vm149_vm10 = vcmp.eq.f32.partialorder %v148_v62, 8.507059e+37 }
 0x278   :  { %vm164_vm11 = vcmp.eq.f32.partialorder %v163_v0, 8.507059e+37 }
 0x27b   :  { %v284_v53 = vpop.eup %283 }
 0x27c   :  { %v286_v54 = vpop.eup %285  ;;  %v140_v55 = vmul.f32 %v284_v53, %v135_v51  ;;  %vm145_vm4 = vweird.f32 %v284_v53 }
 0x27d   :  { %v155_v56 = vmul.f32 %v286_v54, %v136_v52  ;;  %vm160_vm5 = vweird.f32 %v286_v54  ;;  %vm146_vm8 = vmor %vm144_vm6, %vm145_vm4 }
 0x27e   :  { %v141_v57 = vsub.f32 1.0, %v140_v55  ;;  %vm161_vm9 = vmor %vm159_vm7, %vm160_vm5 }
 0x27f   :  { %v156_v58 = vsub.f32 1.0, %v155_v56 }
 0x280   :  { %v142_v61 = vmul.f32 %v284_v53, %v141_v57 }
 0x281   :  { %v157_v63 = vmul.f32 %v286_v54, %v156_v58 }
 0x282   :  { %v143_v1 = vadd.f32 %v284_v53, %v142_v61 }
 0x283   :  { %v158_v2 = vadd.f32 %v286_v54, %v157_v63 }
 0x284   :  { %v147_v7 = vsel %vm146_vm8, %v284_v53, %v143_v1 }
 0x285   :  { %v162_v8 = vsel %vm161_vm9, %v286_v54, %v158_v2  ;;  %v152_v9 = vsel %vm149_vm10, %v151_v3, %v147_v7 }
 0x286   :  { %v167_v10 = vsel %vm164_vm11, %v166_v4, %v162_v8  ;;  %v153_v11 = vmul.f32 %v280_v42, %v152_v9 }
 0x287   :  { %v168_v12 = vmul.f32 %v282_v43, %v167_v10 }
 0x288   :  { %v169_v13 = vpack.c.bf16 %v153_v11, %v153_v11 }
 0x289   :  { %v170_v14 = vpack.c.bf16 %v168_v12, %v168_v12 }
 0x28a   :  { %v172_v15 = vunpack.c.l.b16 %v169_v13 }
 0x28b   :  { %v202_v16 = vunpack.c.l.b16 %v170_v14 }
 0x28c   :  { %v261_v17 = vunpack.i.l.s16 %v172_v15 }
 0x28d   :  { %v263_v18 = vunpack.i.l.s16 %v202_v16 }
 0x28e   :  { %176 = vperm.xlu0 %271, %v261_v17  }
 0x28f   :  { %206 = vperm.xlu2 %270, %v263_v18  }
 0x2e9   :  { %v207_v21 = vpop.permute.xlu2 %206 }
 0x2ea   :  { %v208_v22 = vperm.slane %v207_v21, %v372_v27 }
 0x2ec   :  { %v209_v23 = vpack.c.b16 %v208_v22, %v208_v22 }
 0x2ee   :  { %264 = vmatmul.msk.bf16.vlgmr.msra.gmra.mxu2 %vm180_vm13, %v209_v23 }
 0x300   :  { %v177_v24 = vpop.permute.xlu0 %176 }
 0x301   :  { %v178_v25 = vperm.slane %v177_v24, %v372_v27 }
 0x303   :  { %v179_v26 = vpack.c.b16 %v178_v25, %v178_v25 }
 0x305   :  { %262 = vmatmul.msk.bf16.vlgmr.msra.gmra.mxu1 %vm180_vm13, %v179_v26 }
 0x371   :  { %v225_v28 = vpop.f32.mrf.mxu2 }
 0x372   :  { %v231_v5 = vrot.slane %v225_v28, 7 }
 0x379   :  { %v227_v29 = vpop.f32.mrf.mxu2 }
 0x382   :  { %v197_v6 = vpop.f32.mrf.mxu1 }
 0x383   :  { %v232_v30 = vsel %vm101_vm2, %v231_v5, %v197_v6 }
 0x384   :  { %235 = vst.msk [vmem:[#allocation3] sm:$0x3] %vm234_vm14, %v232_v30 }
 0x385   :  { %246 = dma.vmem_to_hbm [thread:$0]  %s242_s3, 32, %s244_s6, [#allocation4]  }
 0x38a   :  { %v199_v27 = vpop.f32.mrf.mxu1 }
 0x38b   :  { %311 = dma.done.wait [#allocation4], 32  }
 0x38c   :  { %312 = vsyncadd [#allocation4], 4294967264 }
 0x38d   :  { %251 = vsyncpa [#allocation4], 1 }

// kernel: tpu_custom_call.1
= control target key start
LH: loop header
LB: loop body
LE: loop exit
PB: predicated region body
PF: predicated region fallthrough
CT: control target
= control target key end

     0   :  { %s390_s0 = inlined_call_operand.vmem [shape: f32[2,8,32], index: 0, kind: input, shape index: {}]   ;;  %s391_s1 = inlined_call_operand.vmem [shape: bf16[32,16], index: 1, kind: input, shape index: {}]   ;;  %s392_s2 = inlined_call_operand.vmem [shape: f32[1,16], index: 2, kind: input, shape index: {}]   ;;  %s393_s3 = inlined_call_operand.vmem [shape: f32[1,16], index: 3, kind: input, shape index: {}]   ;;  %s394_s4 = inlined_call_operand.<no memory space> [shape: f32[1,1], index: 4, kind: input, shape index: {}]   ;;  %s395_s5 = inlined_call_operand.hbm [shape: f32[2,32], index: 5, kind: output, shape index: {}]  }
   0x1   :  { %v10_v0 = vstv %s394_s4 }
   0x2   :  { %11 = vst [vmem:[#allocation2] sm:$0x1] %v10_v0 }
   0x3   :  { %v266_v1 = vld [vmem:[%s391_s1 + $0x8] sm:$0xff]  ;;  %v24_v2 = vld [vmem:[%s390_s0] sm:$0xff] }
   0x4   :  { %v265_v3 = vld [vmem:[%s391_s1] sm:$0xff]  ;;  %v25_v4 = vld [vmem:[%s390_s0 + $0x8] sm:$0xff]  ;;  %v360_v5 = vpack.c.bf16 %v24_v2, %v24_v2  ;;  %63 = vmatpush.bf16.msra.mxu0 %v266_v1 }
   0x5   :  { %v362_v6 = vpack.c.bf16 %v25_v4, %v25_v4 }
   0x6   :  { %12 = vsyncpa [#allocation4], 0  ;;  %v38_v7 = vunpack.c.l.b16 %v360_v5  ;;  %vm53_vm0 = vcmask 261120   ;;  %v313_v10 = vmov 0   ;;  %v272_v12 = vld [vmem:[%s392_s2] ss:$0 sm:$0xff]  ;;  %v97_v25 = vlaneseq }
   0x7   :  { %v39_v8 = vunpack.c.l.b16 %v362_v6  ;;  %269 = vset.pattern.permute.xlu1 %v313_v10  ;;  %270 = vset.pattern.permute.xlu2 %v313_v10  ;;  %v273_v15 = vld [vmem:[%s393_s3] ss:$0 sm:$0xff]  ;;  %vm79_vm1 = vcmask 130048   ;;  %vm101_vm2 = vcmask 1041409   ;;  %vm104_vm3 = vcmask 58368   ;;  %s314_s2 = smov [#allocation3]  }
   0x8   :  { %64 = vmatpush.bf16.msra.mxu0 %v265_v3  ;;  %271 = vset.pattern.permute.xlu0 %v313_v10  ;;  %v372_v27 = vand.u32 127, %v97_v25  ;;  %vm184_vm12 = vcmask 1043456   ;;  %vm180_vm13 = vcmask 64512   ;;  %s241_s3 = sshll.u32 %s314_s2, 4  ;;  %s243_s6 = sshll.u32 %s395_s5, 4  ;;  %vm234_vm14 = vcmask 254976   ;;  %s242_s3 = int_to_ptr.vmem [resolvable:$true] %s241_s3  ;;  %s244_s6 = int_to_ptr.hbm [resolvable:$true] %s243_s6 }
   0x9   :  { %v40_v9 = vpack.c.b16 %v39_v8, %v38_v7  ;;  %v274_v11 = vld [vmem:[#allocation2] ss:$0 sm:$0xff] }
   0xa   :  { %90 = vperm.xlu1 %269, %v274_v11  }
   0xb   :  { %260 = vmatmul.msk.bf16.vlgmr.msra.gmra.mxu0 %vm53_vm0, %v40_v9 }
  0x7c   :  { %v91_v26 = vpop.permute.xlu1 %90 }
  0x88   :  { %v66_v13 = vpop.f32.mrf.mxu0 }
  0x89   :  { %v67_v14 = vadd.f32 %v272_v12, %v66_v13 }
  0x8b   :  { %275 = vtanh.f32 %v67_v14 }
  0x90   :  { %v68_v16 = vpop.f32.mrf.mxu0 }
  0x91   :  { %v276_v17 = vpop.eup %275  ;;  %v69_v18 = vadd.f32 %v272_v12, %v68_v16 }
  0x92   :  { %v77_v19 = vmul.f32 %v276_v17, %v273_v15 }
  0x93   :  { %277 = vtanh.f32 %v69_v18 }
  0x94   :  { %v80_v20 = vsel %vm79_vm1, %v77_v19, 0.0  ;;  %v214_v19 = vsel %vm184_vm12, %v362_v6, 0 }
  0x95   :  { %81 = vadd.xlane.f32.xlu0 %v80_v20  ;;  %223 = vmatpush.bf16.msra.mxu2 %v214_v19  ;;  %v186_v20 = vsel %vm184_vm12, %v360_v5, 0 }
  0x96   :  { %195 = vmatpush.bf16.msra.mxu1 %v186_v20 }
  0x99   :  { %v278_v21 = vpop.eup %277 }
  0x9a   :  { %v78_v22 = vmul.f32 %v278_v21, %v273_v15 }
  0x9c   :  { %v83_v23 = vsel %vm79_vm1, %v78_v22, 0.0 }
  0x9d   :  { %84 = vadd.xlane.f32.xlu0 %v83_v23 }
 0x108   :  { %v82_v24 = vpop.xlane.xlu0 %81 }
 0x109   :  { %v93_v28 = vadd.f32 %v91_v26, %v82_v24 }
 0x10b   :  { %v99_v31 = vperm.slane %v93_v28, %v372_v27 }
 0x110   :  { %v85_v29 = vpop.xlane.xlu0 %84 }
 0x111   :  { %v94_v30 = vadd.f32 %v91_v26, %v85_v29 }
 0x113   :  { %v100_v32 = vperm.slane %v94_v30, %v372_v27 }
 0x115   :  { %v102_v33 = vsel %vm101_vm2, %v100_v32, %v99_v31 }
 0x116   :  { %v105_v34 = vsel %vm104_vm3, %v102_v33, -inf }
 0x117   :  { %106 = vmax.xlane.f32.xlu1 %v105_v34 }
 0x18a   :  { %v107_v35 = vpop.xlane.xlu1 %106 }
 0x18b   :  { %v109_v36 = vperm.slane %v107_v35, 0  ;;  %v110_v37 = vperm.slane %v107_v35, 1 }
 0x18d   :  { %v113_v38 = vsub.f32 %v93_v28, %v109_v36  ;;  %v114_v40 = vsub.f32 %v94_v30, %v110_v37 }
 0x18f   :  { %v115_v39 = vmul.f32 1.442695, %v113_v38  ;;  %v117_v41 = vmul.f32 1.442695, %v114_v40 }
 0x191   :  { %279 = vpow2.f32 %v115_v39 }
 0x192   :  { %281 = vpow2.f32 %v117_v41 }
 0x197   :  { %v280_v42 = vpop.eup %279 }
 0x198   :  { %122 = vperm.xlu2 %270, %v280_v42   ;;  %v282_v43 = vpop.eup %281 }
 0x1a0   :  { %125 = vperm.xlu2 %270, %v282_v43  }
 0x1f2   :  { %v123_v44 = vpop.permute.xlu2 %122 }
 0x1f3   :  { %v127_v46 = vperm.slane %v123_v44, %v372_v27 }
 0x1fa   :  { %v126_v45 = vpop.permute.xlu2 %125 }
 0x1fb   :  { %v128_v47 = vperm.slane %v126_v45, %v372_v27 }
 0x1fd   :  { %v129_v48 = vsel %vm101_vm2, %v128_v47, %v127_v46 }
 0x1fe   :  { %v131_v49 = vsel %vm104_vm3, %v129_v48, 0.0 }
 0x1ff   :  { %132 = vadd.xlane.f32.xlu0 %v131_v49 }
 0x272   :  { %v133_v50 = vpop.xlane.xlu0 %132 }
 0x273   :  { %v135_v51 = vperm.slane %v133_v50, 0  ;;  %v136_v52 = vperm.slane %v133_v50, 1 }
 0x275   :  { %283 = vrcp.f32 %v135_v51  ;;  %v150_v59 = vand.u32 2147483648, %v135_v51  ;;  %v165_v60 = vand.u32 2147483648, %v136_v52  ;;  %v148_v62 = vand.u32 2147483647, %v135_v51 }
 0x276   :  { %285 = vrcp.f32 %v136_v52  ;;  %v163_v0 = vand.u32 2147483647, %v136_v52  ;;  %vm144_vm6 = vweird.f32 %v135_v51  ;;  %vm159_vm7 = vweird.f32 %v136_v52 }
 0x277   :  { %v151_v3 = vor.u32 1.1754944e-38, %v150_v59  ;;  %v166_v4 = vor.u32 1.1754944e-38, %v165_v60  ;;  %vm149_vm10 = vcmp.eq.f32.partialorder %v148_v62, 8.507059e+37 }
 0x278   :  { %vm164_vm11 = vcmp.eq.f32.partialorder %v163_v0, 8.507059e+37 }
 0x27b   :  { %v284_v53 = vpop.eup %283 }
 0x27c   :  { %v286_v54 = vpop.eup %285  ;;  %v140_v55 = vmul.f32 %v284_v53, %v135_v51  ;;  %vm145_vm4 = vweird.f32 %v284_v53 }
 0x27d   :  { %v155_v56 = vmul.f32 %v286_v54, %v136_v52  ;;  %vm160_vm5 = vweird.f32 %v286_v54  ;;  %vm146_vm8 = vmor %vm144_vm6, %vm145_vm4 }
 0x27e   :  { %v141_v57 = vsub.f32 1.0, %v140_v55  ;;  %vm161_vm9 = vmor %vm159_vm7, %vm160_vm5 }
 0x27f   :  { %v156_v58 = vsub.f32 1.0, %v155_v56 }
 0x280   :  { %v142_v61 = vmul.f32 %v284_v53, %v141_v57 }
 0x281   :  { %v157_v63 = vmul.f32 %v286_v54, %v156_v58 }
 0x282   :  { %v143_v1 = vadd.f32 %v284_v53, %v142_v61 }
 0x283   :  { %v158_v2 = vadd.f32 %v286_v54, %v157_v63 }
 0x284   :  { %v147_v7 = vsel %vm146_vm8, %v284_v53, %v143_v1 }
 0x285   :  { %v162_v8 = vsel %vm161_vm9, %v286_v54, %v158_v2  ;;  %v152_v9 = vsel %vm149_vm10, %v151_v3, %v147_v7 }
 0x286   :  { %v167_v10 = vsel %vm164_vm11, %v166_v4, %v162_v8  ;;  %v153_v11 = vmul.f32 %v280_v42, %v152_v9 }
 0x287   :  { %v168_v12 = vmul.f32 %v282_v43, %v167_v10 }
 0x288   :  { %v169_v13 = vpack.c.bf16 %v153_v11, %v153_v11 }
 0x289   :  { %v170_v14 = vpack.c.bf16 %v168_v12, %v168_v12 }
 0x28a   :  { %v172_v15 = vunpack.c.l.b16 %v169_v13 }
 0x28b   :  { %v202_v16 = vunpack.c.l.b16 %v170_v14 }
 0x28c   :  { %v261_v17 = vunpack.i.l.s16 %v172_v15 }
 0x28d   :  { %v263_v18 = vunpack.i.l.s16 %v202_v16 }
 0x28e   :  { %176 = vperm.xlu0 %271, %v261_v17  }
 0x28f   :  { %206 = vperm.xlu2 %270, %v263_v18  }
 0x2e9   :  { %v207_v21 = vpop.permute.xlu2 %206 }
 0x2ea   :  { %v208_v22 = vperm.slane %v207_v21, %v372_v27 }
 0x2ec   :  { %v209_v23 = vpack.c.b16 %v208_v22, %v208_v22 }
 0x2ee   :  { %264 = vmatmul.msk.bf16.vlgmr.msra.gmra.mxu2 %vm180_vm13, %v209_v23 }
 0x300   :  { %v177_v24 = vpop.permute.xlu0 %176 }
 0x301   :  { %v178_v25 = vperm.slane %v177_v24, %v372_v27 }
 0x303   :  { %v179_v26 = vpack.c.b16 %v178_v25, %v178_v25 }
 0x305   :  { %262 = vmatmul.msk.bf16.vlgmr.msra.gmra.mxu1 %vm180_vm13, %v179_v26 }
 0x371   :  { %v225_v28 = vpop.f32.mrf.mxu2 }
 0x372   :  { %v231_v5 = vrot.slane %v225_v28, 7 }
 0x379   :  { %v227_v29 = vpop.f32.mrf.mxu2 }
 0x382   :  { %v197_v6 = vpop.f32.mrf.mxu1 }
 0x383   :  { %v232_v30 = vsel %vm101_vm2, %v231_v5, %v197_v6 }
 0x384   :  { %235 = vst.msk [vmem:[#allocation3] sm:$0x3] %vm234_vm14, %v232_v30 }
 0x385   :  { %246 = dma.vmem_to_hbm [thread:$0]  %s242_s3, 32, %s244_s6, [#allocation4]  }
 0x38a   :  { %v199_v27 = vpop.f32.mrf.mxu1 }
 0x38b   :  { %311 = dma.done.wait [#allocation4], 32  }
 0x38c   :  { %312 = vsyncadd [#allocation4], 4294967264 }
 0x38d   :  { %251 = vsyncpa [#allocation4], 1 }

</bundles_post_ra>
